<compile_context>
chip_gen: v5e
topology: v5e:2x2
jax: 0.10.0
libtpu: 0.0.40
codegen_flags: <defaults>
</compile_context>

<pallas_src>
import math
from functools import partial

import jax
import jax.numpy as jnp
from jax.experimental import pallas as pl
from jax.experimental.pallas import tpu as pltpu


def make_pe_buffer(d_model: int, max_len: int) -> jnp.ndarray:
    """Deterministic construction of the `pe` buffer, mirroring __init__.

    Handles odd d_model gracefully (cos column count = d_model // 2)."""
    position = jnp.arange(max_len, dtype=jnp.float32)[:, None]            # (max_len, 1)
    div_term = jnp.exp(
        jnp.arange(0, d_model, 2, dtype=jnp.float32) * (-math.log(10000.0) / d_model)
    )                                                                     # (ceil(D/2),)
    angles = position * div_term                                          # (max_len, ceil(D/2))
    pe = jnp.zeros((max_len, d_model), dtype=jnp.float32)
    pe = pe.at[:, 0::2].set(jnp.sin(angles))
    pe = pe.at[:, 1::2].set(jnp.cos(angles)[:, : d_model // 2])
    return pe[:, None, :]                                                 # (max_len, 1, D)


def _choose_seq_tile(seq_len: int, row_bytes: int,
                     target_tile_bytes: int = 4 * 1024 * 1024) -> int:
    """Seq-tile size: largest multiple-of-8 divisor of seq_len whose tile fits
    the per-buffer target (~4 MiB keeps the 2-in + 2-out double buffers well
    under v7x's 32 MiB default scoped VMEM), preferring >= 2 grid steps so the
    pipeline has something to overlap and v7x megacore can split the grid."""
    divisors = [t for t in range(8, seq_len + 1, 8) if seq_len % t == 0]
    if not divisors:
        # seq_len < 8 or not a multiple of 8: one full-extent block
        # (block_shape == array dims is always legal).
        return seq_len
    fitting = [t for t in divisors if t * row_bytes <= target_tile_bytes]
    ts = max(fitting) if fitting else divisors[0]
    if ts == seq_len and len(divisors) > 1:
        ts = divisors[-2]        # force at least two pipeline steps
    return ts


def _pe_add_kernel(x_ref, pe_ref, pad_ref, o_ref):
    """out[s, b*D + d] = x[s, b*D + d] + pe[padding + s0 + s, d]

    x_ref / o_ref : (ts, B*D)    lane-dense tiles of the flattened input/output
    pe_ref        : (max_len, D) full pe table, resident in VMEM (constant block)
    pad_ref       : (1,) int32 in SMEM — runtime `padding` offset
    """
    ts, bd = x_ref.shape
    d = pe_ref.shape[-1]
    b = bd // d
    start = pad_ref[0] + pl.program_id(0) * ts
    pe_tile = pe_ref[pl.ds(start, ts), :]                    # (ts, D)
    # Replicate pe along lanes so column b*D + d carries pe[s, d]; this matches
    # the row-major (S, B, D) -> (S, B*D) flattening of x. Only the small pe
    # tile is relaid out — the big x/out tiles stay untouched and lane-dense.
    o_ref[...] = x_ref[...] + jnp.tile(pe_tile, (1, b))


@partial(jax.jit, donate_argnums=(0,))
def _pe_forward_impl(x, pe2d, pad_arr):
    seq_len, batch, d_model = x.shape
    max_len = pe2d.shape[0]
    itemsize = x.dtype.itemsize
    row_bytes = batch * d_model * itemsize

    ts = _choose_seq_tile(seq_len, row_bytes)
    num_tiles = seq_len // ts

    # Lane-dense 2-D view (a bitcast under jit): last dim = B*D.
    x2d = x.reshape(seq_len, batch * d_model)

    tile_bytes = ts * row_bytes
    pe_bytes = max_len * d_model * itemsize
    # Budget: double-buffered x tile + out tile + (up to) double-buffered pe.
    vmem_needed = 4 * tile_bytes + 2 * pe_bytes + (1 << 20)
    vmem_limit = int(max(vmem_needed, 16 * 1024 * 1024))

    out2d = pl.pallas_call(
        _pe_add_kernel,
        out_shape=jax.ShapeDtypeStruct((seq_len, batch * d_model), x.dtype),
        grid_spec=pltpu.PrefetchScalarGridSpec(
            num_scalar_prefetch=0,
            grid=(num_tiles,),
            in_specs=[
                # x: tiled along seq, full (lane-dense) row per block.
                pl.BlockSpec((ts, batch * d_model), lambda i: (i, 0)),
                # pe: full table, constant block index -> stays resident in VMEM.
                pl.BlockSpec((max_len, d_model), lambda i: (0, 0)),
                # padding scalar lives in SMEM.
                pl.BlockSpec(memory_space=pltpu.MemorySpace.SMEM),
            ],
            out_specs=pl.BlockSpec((ts, batch * d_model), lambda i: (i, 0)),
        ),
        input_output_aliases={0: 0},   # output reuses the donated x buffer
        compiler_params=pltpu.CompilerParams(
            dimension_semantics=("parallel",),
            vmem_limit_bytes=vmem_limit,
        ),
    )(x2d, pe2d, pad_arr)

    return out2d.reshape(seq_len, batch, d_model)


def positional_encoding_forward(x: jnp.ndarray, pe: jnp.ndarray, padding=0) -> jnp.ndarray:
    """x: (S, B, D); pe: (max_len, 1, D). Returns x + pe[padding:padding+S] (eval-mode dropout).

    NOTE: x's buffer is donated/aliased to the output — do not reuse x afterwards.
    NOTE: at toy sizes (a few KiB) a plain fused XLA add would be faster than any
          kernel launch; dispatch is kept unconditional here so the Pallas path
          is exercised.
    """
    seq_len, _, d_model = x.shape
    max_len = pe.shape[0]
    if isinstance(padding, int):
        if padding < 0 or padding + seq_len > max_len:
            raise ValueError(
                f"pe window [{padding}, {padding + seq_len}) out of range for max_len={max_len}")
    # Drop the size-1 middle dim and keep the add in the input dtype.
    pe2d = pe.reshape(max_len, d_model).astype(x.dtype)
    pad_arr = jnp.asarray([padding], dtype=jnp.int32)
    return _pe_forward_impl(x, pe2d, pad_arr)


if __name__ == "__main__":
    # Small shapes consistent with the module; seq=16 gives a 2-step grid so the
    # pipeline / parallel-axis path is actually exercised.
    SEQ, BATCH, D_MODEL = 16, 2, 32
    MAX_LEN = 64
    PADDING = 3

    key = jax.random.PRNGKey(0)
    x = jax.random.normal(key, (SEQ, BATCH, D_MODEL), dtype=jnp.float32)
    pe = make_pe_buffer(D_MODEL, MAX_LEN)

    # Pure-JAX reference computed BEFORE the kernel call (x is donated there).
    ref = x + pe[PADDING:PADDING + SEQ, :]
    ref = jax.block_until_ready(ref)

    out = positional_encoding_forward(x, pe, padding=PADDING)
    out = jax.block_until_ready(out)

    assert out.shape == (SEQ, BATCH, D_MODEL)
    assert jnp.allclose(out, ref, atol=1e-6, rtol=1e-6)

    print("KERNEL_OK")
</pallas_src>

<mosaic_0001>
module attributes {stable_mosaic.version = 11 : i64} {
  func.func @_pe_add_kernel(%arg0: i32, %arg1: memref<8x64xf32, #tpu.memory_space<vmem>>, %arg2: memref<64x32xf32, #tpu.memory_space<vmem>>, %arg3: memref<1xi32, #tpu.memory_space<smem>>, %arg4: memref<8x64xf32, #tpu.memory_space<vmem>>) attributes {dimension_semantics = [#tpu.dimension_semantics<parallel>], iteration_bounds = array<i64: 2>, scalar_prefetch = 0 : i64, scratch_operands = 0 : i64, tpu.core_type = #tpu.core_type<tc>, window_params = [{transform_indices = @transform_0, window_bounds = array<i64: 8, 64>}, {pipeline_mode = #tpu.pipeline_mode<synchronous>, transform_indices = @transform_1, window_bounds = array<i64: 64, 32>}, {transform_indices = @transform_2, window_bounds = array<i64: 1>}, {transform_indices = @transform_3, window_bounds = array<i64: 8, 64>}]} {
    %c0 = arith.constant 0 : index
    %0 = memref.load %arg3[%c0] : memref<1xi32, #tpu.memory_space<smem>>
    %c8_i32 = arith.constant 8 : i32
    %1 = arith.muli %arg0, %c8_i32 : i32
    %2 = arith.addi %0, %1 : i32
    %3 = arith.index_cast %2 : i32 to index
    %c0_0 = arith.constant 0 : index
    %4 = vector.load %arg2[%3, %c0_0] : memref<64x32xf32, #tpu.memory_space<vmem>>, vector<8x32xf32>
    %c0_1 = arith.constant 0 : index
    %c0_2 = arith.constant 0 : index
    %5 = vector.load %arg1[%c0_1, %c0_2] : memref<8x64xf32, #tpu.memory_space<vmem>>, vector<8x64xf32>
    %6 = tpu.concatenate %4, %4 in 1 : vector<8x32xf32>, vector<8x32xf32> -> vector<8x64xf32>
    %7 = arith.addf %5, %6 : vector<8x64xf32>
    %c0_3 = arith.constant 0 : index
    %c0_4 = arith.constant 0 : index
    %8 = vector.load %arg4[%c0_3, %c0_4] : memref<8x64xf32, #tpu.memory_space<vmem>>, vector<8x64xf32>
    tpu.vector_store %arg4[%c0_3, %c0_4], %7 {strides = array<i32>} : memref<8x64xf32, #tpu.memory_space<vmem>>, vector<8x64xf32>,
    return
  }
  func.func @transform_0(%arg0: i32) -> (i32, i32) {
    %c0_i32 = arith.constant 0 : i32
    %c0_i32_0 = arith.constant 0 : i32
    return %arg0, %c0_i32 : i32, i32
  }
  func.func @transform_1(%arg0: i32) -> (i32, i32) {
    %c0_i32 = arith.constant 0 : i32
    %c0_i32_0 = arith.constant 0 : i32
    %c0_i32_1 = arith.constant 0 : i32
    return %c0_i32, %c0_i32_0 : i32, i32
  }
  func.func @transform_2(%arg0: i32) -> i32 {
    %c0_i32 = arith.constant 0 : i32
    %c0_i32_0 = arith.constant 0 : i32
    return %c0_i32 : i32
  }
  func.func @transform_3(%arg0: i32) -> (i32, i32) {
    %c0_i32 = arith.constant 0 : i32
    %c0_i32_0 = arith.constant 0 : i32
    return %arg0, %c0_i32 : i32, i32
  }
}

</mosaic_0001>

<bundles_post_ra>
// kernel: _pe_forward_impl.1
= control target key start
LH: loop header
LB: loop body
LE: loop exit
PB: predicated region body
PF: predicated region fallthrough
CT: control target
= control target key end

     0   :  { %s289_s14 = smov 0   ;;  %s303_s0 = inlined_call_operand.vmem [shape: f32[16,64], index: 0, kind: input, shape index: {}, may-alias: {0,3}]   ;;  %s304_s1 = inlined_call_operand.vmem [shape: f32[64,32], index: 1, kind: input, shape index: {}]   ;;  %s305_s2 = inlined_call_operand.<no memory space> [shape: s32[1], index: 2, kind: input, shape index: {}]   ;;  %s306_s3 = inlined_call_operand.vmem [shape: f32[16,64], index: 3, kind: output, shape index: {}, may-alias: {0,3}]  }
   0x1   :  { %8 = sst [smem:[#allocation2]] %s305_s2 }
   0x2 LB: > { %s238_s15 = sadd.s32 4294967295, %s263_s14   ;;  %p242_p0 = scmp.ge.s32.totalorder %s263_s14, 1  ;;  %s263_s14 = sphi %s289_s14, %s14_s14  }
   0x3   : > { %p137_p1 = scmp.lt.s32.totalorder %s263_s14, 3 }
   0x5   : > { %p138_p2 = pnand %p242_p0, %p137_p1 }
   0x6   : > { %s167_s16 = sld [smem:[#allocation2]] (!%p138_p2)  ;;  %s245_s17 = sshll.u32 (!%p138_p2), %s238_s15, 3 }
   0x7   : > { %141 = sbr.rel (%p138_p2) target bundleno = 134 (0x86), region = 32  ;;  %s265_s2 = smov (!%p138_p2), 32  }
   0x8   : > { %p159_p3 = scmp.lt.s32.totalorder (!%p138_p2), %s238_s15, 1 }
   0xc   : > { %s169_s18 = sadd.s32 %s245_s17, %s167_s16  ;;  %s308_s15 = smov (!%p159_p3, %s238_s15), 1  ;;  %vm177_vm0 = vcmask 261120   ;;  %vm180_vm1 = vcmask 523264  }
   0xd   : > { %s170_s21 = scalar_lea.vmem %s304_s1, %s169_s18  ;;  %s243_s22 = sshll.u32 %s308_s15, 3 }
   0xe   : > { %v171_v0 = vld [vmem:[%s170_s21] sm:$0xff]  ;;  %s162_s25 = scalar_lea.vmem %s303_s0, %s243_s22  ;;  %s166_s28 = scalar_lea.vmem %s306_s3, %s243_s22 }
   0xf   : > { %174 = vrot.lane.b32.xlu0 %v171_v0, %s265_s2  ;;  %v172_v1 = vld [vmem:[%s162_s25] sm:$0xff] }
  0x81   : > { %v175_v2 = vpop.permute.xlu0 %174 }
  0x82   : > { %v178_v3 = vsel %vm177_vm0, %v171_v0, %v175_v2 }
  0x83   : > { %v179_v4 = vadd.f32 %v178_v3, %v172_v1 }
  0x85   : > { %181 = vst.msk [vmem:[%s166_s28] sm:$0xff] %vm180_vm1, %v179_v4 }
  0x86 PF: > { %s14_s14 = sadd.s32 1, %s263_s14  }
  0x87   : > { %p11_p4 = scmp.ge.s32.totalorder %s14_s14, 4  }
  0x89   :  { %13 = sbr.rel (!%p11_p4) target bundleno = 2 (0x2), region = 63 }

</bundles_post_ra>
